<compile_context>
chip_gen: v6e
topology: v6e:2x2x1
jax: 0.10.0
libtpu: 0.0.40
codegen_flags: <defaults>
</compile_context>

<pallas_src>
import jax
import jax.numpy as jnp
from jax import lax
from jax.experimental import pallas as pl
from jax.experimental.pallas import tpu as pltpu


def _round_up(n, m):
    return ((n + m - 1) // m) * m


def _pack_params(params, dtype):
    """Pack w1,b1,w2,b2,w3,b3 into one (rows, H1) buffer (1 DMA, VMEM-resident).

    Every section starts at a sublane-aligned row (multiple of 8):
      rows [0, IS)             : w1        (IS x H1)
      row  off_b1              : b1        (1 x H1)
      rows [off_w2, off_w2+H1) : w2        (H1 x H2), cols [0, H2)
      row  off_b2              : b2        (1 x H2),  cols [0, H2)
      row  off_w3              : w3^T      (1 x H2),  cols [0, H2)
      row  off_b3              : b3        (1 x 1)
    """
    IS, H1 = params["w1"].shape
    H2 = params["w2"].shape[1]
    off_b1 = _round_up(IS, 8)
    off_w2 = off_b1 + 8
    off_b2 = off_w2 + H1
    off_w3 = off_b2 + 8
    off_b3 = off_w3 + 8
    rows = off_b3 + 8

    buf = jnp.zeros((rows, H1), dtype)
    buf = buf.at[0:IS, :].set(params["w1"].astype(dtype))
    buf = buf.at[off_b1:off_b1 + 1, :].set(params["b1"].astype(dtype))
    buf = buf.at[off_w2:off_w2 + H1, 0:H2].set(params["w2"].astype(dtype))
    buf = buf.at[off_b2:off_b2 + 1, 0:H2].set(params["b2"].astype(dtype))
    buf = buf.at[off_w3:off_w3 + 1, 0:H2].set(params["w3"].T.astype(dtype))
    buf = buf.at[off_b3:off_b3 + 1, 0:1].set(params["b3"].astype(dtype))

    offs = dict(IS=IS, H1=H1, H2=H2, b1=off_b1, w2=off_w2, b2=off_b2,
                w3=off_w3, b3=off_b3, rows=rows)
    return buf, offs


def _make_kernel(offs, compute_dtype):
    IS, H1, H2 = offs["IS"], offs["H1"], offs["H2"]
    ob1, ow2, ob2 = offs["b1"], offs["w2"], offs["b2"]
    ow3, ob3 = offs["w3"], offs["b3"]

    def kernel(x_ref, p_ref, o_ref):
        x = x_ref[...]                                   # (TB, IS) compute_dtype

        # fc1 + relu (accumulate in f32 on the MXU, elementwise in f32)
        w1 = p_ref[0:IS, :]                              # (IS, H1)
        b1 = p_ref[ob1:ob1 + 1, :].astype(jnp.float32)   # (1, H1)
        h1 = jnp.dot(x, w1, preferred_element_type=jnp.float32) + b1
        h1 = jnp.maximum(h1, 0.0)                        # (TB, H1) f32

        # fc2 + relu
        w2 = p_ref[ow2:ow2 + H1, 0:H2]                   # (H1, H2)
        b2 = p_ref[ob2:ob2 + 1, 0:H2].astype(jnp.float32)
        h2 = jnp.dot(h1.astype(compute_dtype), w2,
                     preferred_element_type=jnp.float32) + b2
        h2 = jnp.maximum(h2, 0.0)                        # (TB, H2) f32

        # fc3: contract w3^T (1,H2) with h2 (TB,H2) on their last dims
        # -> (1, TB): lane-dense output row (avoids masked (TB,1) stores).
        w3r = p_ref[ow3:ow3 + 1, 0:H2]                   # (1, H2)
        b3 = p_ref[ob3:ob3 + 1, 0:1].astype(jnp.float32)  # (1, 1)
        out_row = lax.dot_general(
            w3r, h2.astype(compute_dtype),
            dimension_numbers=(((1,), (1,)), ((), ())),
            preferred_element_type=jnp.float32) + b3     # (1, TB)
        o_ref[...] = out_row.astype(o_ref.dtype)

    return kernel


def simple_model_forward(x, params, *, block_b=1024, compute_dtype=jnp.float32):
    """x: [B, input_size]. params: dict with w1,b1,w2,b2,w3,b3 ([in,out] weights).

    Returns [B, 1] float32. compute_dtype=jnp.bfloat16 halves x HBM traffic
    (f32 accumulation is kept on the MXU).
    """
    B, IS = x.shape
    p_buf, offs = _pack_params(params, compute_dtype)
    assert offs["IS"] == IS
    H1, H2 = offs["H1"], offs["H2"]

    # Batch tile: single full-extent tile for small B; otherwise a large tile
    # (multiple of 128 so the (1, TB) output block stays lane-aligned).
    if B <= block_b:
        TB = _round_up(max(B, 8), 8)
    else:
        TB = max(128, _round_up(block_b, 128))
    B_pad = _round_up(B, TB)
    nb = B_pad // TB

    x_p = x.astype(compute_dtype)
    if B_pad != B:
        x_p = jnp.pad(x_p, ((0, B_pad - B), (0, 0)))

    itemsize = jnp.dtype(compute_dtype).itemsize
    cost = pl.CostEstimate(
        flops=2 * B_pad * (IS * H1 + H1 * H2 + H2),
        transcendentals=0,
        bytes_accessed=B_pad * IS * itemsize + p_buf.size * itemsize + B_pad * 4,
    )

    out_row = pl.pallas_call(
        _make_kernel(offs, compute_dtype),
        out_shape=jax.ShapeDtypeStruct((1, B_pad), jnp.float32),
        grid=(nb,),
        in_specs=[
            # x streams over the batch grid (double-buffered by Pallas).
            pl.BlockSpec((TB, IS), lambda i: (i, 0)),
            # Packed params: constant index_map -> resident in VMEM, no re-DMA.
            pl.BlockSpec((offs["rows"], H1), lambda i: (0, 0)),
        ],
        # Lane-dense (1, TB) output blocks.
        out_specs=pl.BlockSpec((1, TB), lambda i: (0, i)),
        compiler_params=pltpu.CompilerParams(
            dimension_semantics=("parallel",)),   # megacore on v7x, no-op on v5e/v6e
        cost_estimate=cost,
        # NOTE: vmem_limit_bytes deliberately left at default (usage is tiny).
    )(x_p, p_buf)

    return out_row[:, :B].reshape(B, 1).astype(jnp.float32)


def init_params(input_size, key):
    """torch.nn.Linear-style init (U[-1/sqrt(in), 1/sqrt(in)]), weights as [in, out]."""
    ks = jax.random.split(key, 6)

    def linear(kw, kb, fan_in, fan_out):
        bound = 1.0 / jnp.sqrt(fan_in)
        w = jax.random.uniform(kw, (fan_in, fan_out), jnp.float32, -bound, bound)
        b = jax.random.uniform(kb, (1, fan_out), jnp.float32, -bound, bound)
        return w, b

    w1, b1 = linear(ks[0], ks[1], input_size, 64)
    w2, b2 = linear(ks[2], ks[3], 64, 32)
    w3, b3 = linear(ks[4], ks[5], 32, 1)
    return {"w1": w1, "b1": b1, "w2": w2, "b2": b2, "w3": w3, "b3": b3}


def reference_forward(x, p):
    h1 = jnp.maximum(x @ p["w1"] + p["b1"], 0.0)
    h2 = jnp.maximum(h1 @ p["w2"] + p["b2"], 0.0)
    return h2 @ p["w3"] + p["b3"]


if __name__ == "__main__":
    key = jax.random.PRNGKey(0)
    k_x, k_p, k_x2 = jax.random.split(key, 3)

    input_size = 32
    params = init_params(input_size, k_p)

    # Small batch: latency path (single grid point, 2 input DMAs total).
    x_small = jax.random.normal(k_x, (8, input_size), jnp.float32)
    out_small = jax.block_until_ready(simple_model_forward(x_small, params))
    ref_small = reference_forward(x_small, params)
    assert out_small.shape == (8, 1)
    assert jnp.allclose(out_small, ref_small, atol=1e-4, rtol=1e-4)

    # Larger, non-multiple batch: exercises the batch grid (TB=512), padding,
    # resident weights and the lane-dense output path.
    x_big = jax.random.normal(k_x2, (1000, input_size), jnp.float32)
    out_big = jax.block_until_ready(
        simple_model_forward(x_big, params, block_b=512))
    ref_big = reference_forward(x_big, params)
    assert out_big.shape == (1000, 1)
    assert jnp.allclose(out_big, ref_big, atol=1e-4, rtol=1e-4)

    # Optional bf16 input/weight path (v6e/v7x bandwidth optimization), f32 accum.
    out_bf16 = jax.block_until_ready(
        simple_model_forward(x_big, params, block_b=512,
                             compute_dtype=jnp.bfloat16))
    assert out_bf16.shape == (1000, 1)
    assert float(jnp.max(jnp.abs(out_bf16 - ref_big))) < 0.25

    # TODO(synk): training loop (MSE loss, SGD/Adam update, DataLoader) from the
    # original script is host-side orchestration, not part of the forward kernel.
    print("KERNEL_OK")
</pallas_src>

<mosaic_0001>
module attributes {stable_mosaic.version = 11 : i64} {
  func.func @kernel(%arg0: i32, %arg1: memref<8x32xf32, #tpu.memory_space<vmem>>, %arg2: memref<128x64xf32, #tpu.memory_space<vmem>>, %arg3: memref<1x8xf32, #tpu.memory_space<vmem>>) attributes {dimension_semantics = [#tpu.dimension_semantics<parallel>], iteration_bounds = array<i64: 1>, scalar_prefetch = 0 : i64, scratch_operands = 0 : i64, tpu.core_type = #tpu.core_type<tc>, window_params = [{transform_indices = @transform_0, window_bounds = array<i64: 8, 32>}, {pipeline_mode = #tpu.pipeline_mode<synchronous>, transform_indices = @transform_1, window_bounds = array<i64: 128, 64>}, {transform_indices = @transform_2, window_bounds = array<i64: 1, 8>}]} {
    %c0 = arith.constant 0 : index
    %c0_0 = arith.constant 0 : index
    %0 = vector.load %arg1[%c0, %c0_0] : memref<8x32xf32, #tpu.memory_space<vmem>>, vector<8x32xf32>
    %c0_1 = arith.constant 0 : index
    %c0_2 = arith.constant 0 : index
    %1 = vector.load %arg2[%c0_1, %c0_2] : memref<128x64xf32, #tpu.memory_space<vmem>>, vector<32x64xf32>
    %c32 = arith.constant 32 : index
    %c0_3 = arith.constant 0 : index
    %2 = vector.load %arg2[%c32, %c0_3] : memref<128x64xf32, #tpu.memory_space<vmem>>, vector<1x64xf32>
    %cst = arith.constant dense<0.000000e+00> : vector<8x64xf32>
    %3 = tpu.matmul %0, %1, %cst {dimension_numbers = #tpu.dot_dimension_numbers<[1], [0], [0], [1], [0, 0, 1, 1], [], []>} : vector<8x32xf32>, vector<32x64xf32>, vector<8x64xf32> -> vector<8x64xf32>
    %4 = vector.broadcast %2 : vector<1x64xf32> to vector<8x64xf32>
    %5 = arith.addf %3, %4 : vector<8x64xf32>
    %cst_4 = arith.constant 0.000000e+00 : f32
    %6 = vector.broadcast %cst_4 : f32 to vector<8x64xf32>
    %7 = arith.maximumf %5, %6 : vector<8x64xf32>
    %c40 = arith.constant 40 : index
    %c0_5 = arith.constant 0 : index
    %8 = vector.load %arg2[%c40, %c0_5] : memref<128x64xf32, #tpu.memory_space<vmem>>, vector<64x32xf32>
    %c104 = arith.constant 104 : index
    %c0_6 = arith.constant 0 : index
    %9 = vector.load %arg2[%c104, %c0_6] : memref<128x64xf32, #tpu.memory_space<vmem>>, vector<1x32xf32>
    %cst_7 = arith.constant dense<0.000000e+00> : vector<8x32xf32>
    %10 = tpu.matmul %7, %8, %cst_7 {dimension_numbers = #tpu.dot_dimension_numbers<[1], [0], [0], [1], [0, 0, 1, 1], [], []>} : vector<8x64xf32>, vector<64x32xf32>, vector<8x32xf32> -> vector<8x32xf32>
    %11 = vector.broadcast %9 : vector<1x32xf32> to vector<8x32xf32>
    %12 = arith.addf %10, %11 : vector<8x32xf32>
    %cst_8 = arith.constant 0.000000e+00 : f32
    %13 = vector.broadcast %cst_8 : f32 to vector<8x32xf32>
    %14 = arith.maximumf %12, %13 : vector<8x32xf32>
    %c112 = arith.constant 112 : index
    %c0_9 = arith.constant 0 : index
    %15 = vector.load %arg2[%c112, %c0_9] : memref<128x64xf32, #tpu.memory_space<vmem>>, vector<1x32xf32>
    %c120 = arith.constant 120 : index
    %c0_10 = arith.constant 0 : index
    %16 = vector.load %arg2[%c120, %c0_10] : memref<128x64xf32, #tpu.memory_space<vmem>>, vector<1x1xf32>
    %cst_11 = arith.constant dense<0.000000e+00> : vector<1x8xf32>
    %17 = tpu.matmul %15, %14, %cst_11 {dimension_numbers = #tpu.dot_dimension_numbers<[1], [1], [0], [0], [0, 0, 1, 0], [], []>} : vector<1x32xf32>, vector<8x32xf32>, vector<1x8xf32> -> vector<1x8xf32>
    %18 = vector.broadcast %16 : vector<1x1xf32> to vector<1x8xf32>
    %19 = arith.addf %17, %18 : vector<1x8xf32>
    %c0_12 = arith.constant 0 : index
    %c0_13 = arith.constant 0 : index
    %20 = vector.load %arg3[%c0_12, %c0_13] : memref<1x8xf32, #tpu.memory_space<vmem>>, vector<1x8xf32>
    tpu.vector_store %arg3[%c0_12, %c0_13], %19 {strides = array<i32>} : memref<1x8xf32, #tpu.memory_space<vmem>>, vector<1x8xf32>,
    return
  }
  func.func @transform_0(%arg0: i32) -> (i32, i32) {
    %c0_i32 = arith.constant 0 : i32
    %c0_i32_0 = arith.constant 0 : i32
    return %arg0, %c0_i32 : i32, i32
  }
  func.func @transform_1(%arg0: i32) -> (i32, i32) {
    %c0_i32 = arith.constant 0 : i32
    %c0_i32_0 = arith.constant 0 : i32
    %c0_i32_1 = arith.constant 0 : i32
    return %c0_i32, %c0_i32_0 : i32, i32
  }
  func.func @transform_2(%arg0: i32) -> (i32, i32) {
    %c0_i32 = arith.constant 0 : i32
    %c0_i32_0 = arith.constant 0 : i32
    return %c0_i32, %arg0 : i32, i32
  }
}

</mosaic_0001>

<bundles_post_ra>
// kernel: tpu_custom_call.1
= control target key start
LH: loop header
LB: loop body
LE: loop exit
PB: predicated region body
PF: predicated region fallthrough
CT: control target
= control target key end

     0   :  { %v368_v1 = vmov 0.0   ;;  %vm369_vm0 = vmmov 0   ;;  %s447_s0 = inlined_call_operand.vmem [shape: f32[8,32], index: 0, kind: input, shape index: {}]   ;;  %s448_s1 = inlined_call_operand.vmem [shape: f32[128,64], index: 1, kind: input, shape index: {}]   ;;  %s449_s2 = inlined_call_operand.hbm [shape: f32[1,8], index: 2, kind: output, shape index: {}]  }
   0x1   :  { %v16_v0 = vld [vmem:[%s448_s1 + $0x18] sm:$0xff]  ;;  %306 = vmatprep.subr.mxu0 %v368_v1  ;;  %v15_v2 = vld [vmem:[%s448_s1 + $0x10] sm:$0xff]  ;;  %314 = vmatprep.mubr.msk.f32.mxu0 %vm369_vm0, %v368_v1  ;;  %v104_v3 = vld [vmem:[%s448_s1 + $0x60] sm:$0xff] }
   0x2   :  { %307 = vmatpush3.msra.mxu0 %v16_v0  ;;  %317 = vmatprep.subr.mxu1 %v368_v1  ;;  %v103_v4 = vld [vmem:[%s448_s1 + $0x58] sm:$0xff]  ;;  %v14_v5 = vld [vmem:[%s448_s1 + $0x8] sm:$0xff] }
   0x3   :  { %308 = vmatprep.subr.mxu0 %v368_v1  ;;  %318 = vmatpush3.msra.mxu1 %v104_v3 }
   0x4   :  { %7 = vsyncpa [#allocation3], 0  ;;  %309 = vmatpush3.msra.mxu0 %v15_v2  ;;  %319 = vmatprep.subr.mxu1 %v368_v1  ;;  %v102_v6 = vld [vmem:[%s448_s1 + $0x50] sm:$0xff]  ;;  %v13_v7 = vld [vmem:[%s448_s1] sm:$0xff]  ;;  %vm22_vm1 = vcmask 261120   ;;  %vm110_vm2 = vcmask 523264  }
   0x5   :  { %310 = vmatprep.subr.mxu0 %v368_v1  ;;  %320 = vmatpush3.msra.mxu1 %v103_v4  ;;  %v12_v8 = vld [vmem:[%s447_s0] sm:$0xff]  ;;  %v101_v9 = vld [vmem:[%s448_s1 + $0x48] sm:$0xff]  ;;  %v99_v11 = vld [vmem:[%s448_s1 + $0x38] sm:$0xff]  ;;  %v370_v20 = vmov 0   ;;  %s371_s14 = smov [#allocation2]   ;;  %vm268_vm3 = vcmask 57344  }
   0x6   :  { %311 = vmatpush3.msra.mxu0 %v14_v5  ;;  %321 = vmatprep.subr.mxu1 %v368_v1  ;;  %v100_v10 = vld [vmem:[%s448_s1 + $0x40] sm:$0xff]  ;;  %v98_v12 = vld [vmem:[%s448_s1 + $0x30] sm:$0xff]  ;;  %v97_v13 = vld [vmem:[%s448_s1 + $0x28] sm:$0xff]  ;;  %s276_s15 = sshll.u32 %s371_s14, 4  ;;  %s277_s15 = int_to_ptr.vmem [resolvable:$true] %s276_s15 }
   0x7   :  { %312 = vmatprep.subr.mxu0 %v368_v1  ;;  %322 = vmatpush3.msra.mxu1 %v102_v6  ;;  %v284_v14 = vld [vmem:[%s448_s1 + $0x20] ss:$0 sm:$0xff]  ;;  %v186_v19 = vld [vmem:[%s448_s1 + $0x78] sm:$0x1]  ;;  %v286_v21 = vld [vmem:[%s448_s1 + $0x68] ss:$0 sm:$0xff]  ;;  %p351_p1 = scmp.lt.s32.totalorder %s277_s15, %s277_s15 }
   0x8   :  { %313 = vmatpush3.msra.mxu0 %v13_v7  ;;  %323 = vmatprep.subr.mxu1 %v368_v1  ;;  %v185_v26 = vld [vmem:[%s448_s1 + $0x70] sm:$0x1]  ;;  %s346_s16 = scalar_lea.vmem %s277_s15, 16  ;;  %s350_s17 = scalar_lea.vmem %s277_s15, 32 }
   0x9   :  { %315 = vmatmul.mubr.msk.f32.vlgmr.msra.gmra.mxu0 %vm22_vm1, %v12_v8  ;;  %324 = vmatpush3.msra.mxu1 %v101_v9  ;;  %p347_p0 = scmp.ne.s32.totalorder %s277_s15, %s346_s16  ;;  %p352_p2 = scmp.lt.s32.totalorder %s350_s17, %s346_s16 }
   0xa   :  { %325 = vmatprep.subr.mxu1 %v368_v1  ;;  %333 = vmatprep.mubr.msk.f32.mxu1 %vm369_vm0, %v368_v1 }
   0xb   :  { %326 = vmatpush3.msra.mxu1 %v100_v10  ;;  %336 = vmatprep.subr.mxu0 %v368_v1  ;;  %p353_p3 = por %p352_p2, %p351_p1 }
   0xc   :  { %327 = vmatprep.subr.mxu1 %v368_v1  ;;  %338 = vmatprep.mubr.msk.f32.mxu0 %vm369_vm0, %v368_v1 }
   0xd   :  { %328 = vmatpush3.msra.mxu1 %v99_v11  ;;  %345 = vset.pattern.permute.xlu0 %v370_v20  ;;  %p354_p4 = pnand %p353_p3, %p347_p0 }
   0xe   :  { %329 = vmatprep.subr.mxu1 %v368_v1  ;;  %189 = vperm.xlu0 %345, %v186_v19  }
   0xf   :  { %330 = vmatpush3.msra.mxu1 %v98_v12 }
  0x10   :  { %331 = vmatprep.subr.mxu1 %v368_v1 }
  0x11   :  { %332 = vmatpush3.msra.mxu1 %v97_v13 }
  0x89   :  { %v190_v27 = vpop.permute.xlu0 %189 }
  0xc9   :  { %v92_v15 = vpop.f32.mrf.mxu0 }
  0xca   :  { %v93_v16 = vadd.f32 %v284_v14, %v92_v15 }
  0xcb   :  { %v316_v17 = vpop.f32.mrf.mxu0 }
  0xcc   :  { %v96_v18 = vmax.f32 %v93_v16, 0.0 }
  0xce   :  { %334 = vmatmul.mubr.msk.f32.vlgmr.msra.gmra.mxu1 %vm110_vm2, %v96_v18 }
 0x18e   :  { %v180_v22 = vpop.f32.mrf.mxu1 }
 0x18f   :  { %v181_v23 = vadd.f32 %v286_v21, %v180_v22 }
 0x190   :  { %v335_v24 = vpop.f32.mrf.mxu1 }
 0x191   :  { %v184_v25 = vmax.f32 %v181_v23, 0.0 }
 0x193   :  { %337 = vmatpush3.xpose.msk.msra.mxu0 %vm22_vm1, %v184_v25 }
 0x196   :  { %339 = vmatmul.mubr.msk.f32.vlgmr.msra.gmra.mxu0 %vm22_vm1, %v185_v26 }
 0x256   :  { %v264_v28 = vpop.f32.mrf.mxu0 }
 0x257   :  { %v265_v29 = vadd.f32 %v264_v28, %v190_v27 }
 0x258   :  { %v340_v30 = vpop.f32.mrf.mxu0 }
 0x259   :  { %269 = vst.msk [vmem:[#allocation2] sm:$0x1] %vm268_vm3, %v265_v29 }
 0x25a   :  { %357 = shalt.err (!%p354_p4)
}
 0x25b   :  { %279 = dma.vmem_to_hbm [thread:$0]  %s277_s15, 16, %s449_s2, [#allocation3]  }
 0x25c   :  { %366 = dma.done.wait [#allocation3], 16  }
 0x25d   :  { %367 = vsyncadd [#allocation3], 4294967280 }
 0x25e   :  { %283 = vsyncpa [#allocation3], 1 }

</bundles_post_ra>
